<compile_context>
chip_gen: v6e
topology: v6e:2x2x1
jax: 0.10.0
libtpu: 0.0.40
codegen_flags: <defaults>
</compile_context>

<pallas_src>
import functools

import jax
import jax.numpy as jnp
from jax.experimental import pallas as pl
from jax.experimental.pallas import tpu as pltpu


def _round_up(x, m):
    return (x + m - 1) // m * m


# ---------------------------------------------------------------------------
# Parameter packing: one (rows, 128) f32 slab, transposed (out, in) weights,
# all sections aligned to 8 sublanes. Done once, reused every call.
# ---------------------------------------------------------------------------
def pack_params(params, s_dim, h_dim):
    """Pack (w0,b0,w1,b1,w2,b2) into a single zero-padded VMEM-friendly slab.

    Weights are stored transposed (out_features, in_features) so the kernel
    computes h = relu(W @ x^T + b) with the batch on the lane axis.
    """
    w0, b0, w1, b1, w2, b2 = params
    s_pad = _round_up(s_dim, 8)
    h_pad = _round_up(h_dim, 8)
    lane = 128
    assert max(s_pad, h_dim) <= lane, "this packing assumes s_dim, h_dim <= 128"

    o_w0 = 0                    # rows [o_w0, o_w0+h_dim): W0^T  (h_dim, s_dim)
    o_w1 = o_w0 + h_pad         # rows [o_w1, o_w1+h_dim): W1^T  (h_dim, h_dim)
    o_misc = o_w1 + h_pad       # lane 0: w2 column, lane 1: b0, lane 2: b1,
    rows = o_misc + h_pad       # lane 3 row 0: b2 scalar

    slab = jnp.zeros((rows, lane), jnp.float32)
    slab = slab.at[o_w0:o_w0 + h_dim, :s_dim].set(w0.T)
    slab = slab.at[o_w1:o_w1 + h_dim, :h_dim].set(w1.T)
    slab = slab.at[o_misc:o_misc + h_dim, 0].set(w2.reshape(h_dim))
    slab = slab.at[o_misc:o_misc + h_dim, 1].set(b0.reshape(h_dim))
    slab = slab.at[o_misc:o_misc + h_dim, 2].set(b1.reshape(h_dim))
    slab = slab.at[o_misc, 3].set(b2.reshape(()))
    offs = dict(w0=o_w0, w1=o_w1, misc=o_misc, s_pad=s_pad)
    return slab, offs


# ---------------------------------------------------------------------------
# Fused kernel: one batch tile (in lanes) per grid step, param slab resident.
# ---------------------------------------------------------------------------
def _vnet_kernel(x_ref, slab_ref, o_ref, *, s_pad, h_dim, offs):
    x_t = x_ref[...]                                            # (s_pad, TILE_B)

    # fc0 + ReLU:  (h_dim, s_pad) @ (s_pad, TILE_B) -> (h_dim, TILE_B).
    # Padding rows of x_t and padding lanes of W0 are zero, so the result is exact.
    w0 = slab_ref[offs["w0"]:offs["w0"] + h_dim, :s_pad]
    b0 = slab_ref[offs["misc"]:offs["misc"] + h_dim, 1:2]       # (h_dim, 1) column
    h1 = jnp.maximum(
        jnp.dot(w0, x_t, preferred_element_type=jnp.float32) + b0, 0.0)

    # fc1 + ReLU:  (h_dim, h_dim) @ (h_dim, TILE_B) -> (h_dim, TILE_B).
    w1 = slab_ref[offs["w1"]:offs["w1"] + h_dim, :h_dim]
    b1 = slab_ref[offs["misc"]:offs["misc"] + h_dim, 2:3]
    h2 = jnp.maximum(
        jnp.dot(w1, h1, preferred_element_type=jnp.float32) + b1, 0.0)

    # fc2 (output width 1): VPU multiply + sublane reduction -> lane-dense
    # (1, TILE_B) row (no degenerate MXU matmul, no masked stores).
    w2 = slab_ref[offs["misc"]:offs["misc"] + h_dim, 0:1]       # (h_dim, 1) column
    b2 = slab_ref[offs["misc"]:offs["misc"] + 1, 3:4]           # (1, 1)
    out = jnp.sum(h2 * w2, axis=0, keepdims=True) + b2          # (1, TILE_B)

    o_ref[...] = out.astype(o_ref.dtype)


# ---------------------------------------------------------------------------
# Wrapper: batch tiled along lanes, weights DMA'd once, parallel semantics.
# ---------------------------------------------------------------------------
def v_net_forward(state, slab, offs, s_dim, h_dim, *, tile_b=8192):
    """Pallas forward pass. state: (B, s_dim) f32 -> (B, 1) f32."""
    B = state.shape[0]
    s_pad = offs["s_pad"]

    # Lane tile must be a multiple of 128; clamp to the (padded) batch.
    tile_b = max(128, _round_up(min(tile_b, B), 128))
    b_pad = _round_up(B, tile_b)

    # Batch-in-lanes: (B, s_dim) -> zero-padded (s_pad, b_pad). Pure layout
    # plumbing done once in the wrapper.
    x_t = jnp.zeros((s_pad, b_pad), jnp.float32).at[:s_dim, :B].set(state.T)

    rows, lane = slab.shape
    kernel = functools.partial(_vnet_kernel, s_pad=s_pad, h_dim=h_dim, offs=offs)

    flops = 2 * b_pad * (s_dim * h_dim + h_dim * h_dim + h_dim)
    bytes_accessed = 4 * (b_pad * s_pad + b_pad + rows * lane)

    out = pl.pallas_call(
        kernel,
        out_shape=jax.ShapeDtypeStruct((1, b_pad), jnp.float32),
        grid=(b_pad // tile_b,),
        in_specs=[
            pl.BlockSpec((s_pad, tile_b), lambda i: (0, i)),    # x^T: tiled over lanes
            pl.BlockSpec((rows, lane), lambda i: (0, 0)),       # param slab: resident
        ],
        out_specs=pl.BlockSpec((1, tile_b), lambda i: (0, i)),  # lane-dense output row
        compiler_params=pltpu.CompilerParams(
            dimension_semantics=("parallel",)),                 # megacore batch split
        cost_estimate=pl.CostEstimate(
            flops=flops, transcendentals=0, bytes_accessed=bytes_accessed),
    )(x_t, slab)
    return out[0, :B].reshape(B, 1)


# ---------------------------------------------------------------------------
# Deterministic synthetic parameters (PyTorch-Linear-like uniform init).
# Weights generated as (in_features, out_features) so the reference is x @ W + b.
# ---------------------------------------------------------------------------
def init_params(key, s_dim, h_dim):
    ks = jax.random.split(key, 6)

    def lin(kw, kb, fan_in, fan_out):
        bound = 1.0 / jnp.sqrt(jnp.float32(fan_in))
        w = jax.random.uniform(kw, (fan_in, fan_out), jnp.float32, -bound, bound)
        b = jax.random.uniform(kb, (1, fan_out), jnp.float32, -bound, bound)
        return w, b

    w0, b0 = lin(ks[0], ks[1], s_dim, h_dim)
    w1, b1 = lin(ks[2], ks[3], h_dim, h_dim)
    w2, b2 = lin(ks[4], ks[5], h_dim, 1)
    return (w0, b0, w1, b1, w2, b2)


def v_net_reference(state, params):
    w0, b0, w1, b1, w2, b2 = params
    h1 = jnp.maximum(state @ w0 + b0, 0.0)
    h2 = jnp.maximum(h1 @ w1 + b1, 0.0)
    return h2 @ w2 + b2


if __name__ == "__main__":
    # Pendulum-v1: s_dim = 3 (cos(theta), sin(theta), theta_dot); h_dim = 32.
    B, S_DIM, H_DIM = 8, 3, 32

    key = jax.random.PRNGKey(0)
    k_state, k_params = jax.random.split(key)
    state = jax.random.normal(k_state, (B, S_DIM), dtype=jnp.float32)
    params = init_params(k_params, S_DIM, H_DIM)

    # Pack the six parameter tensors into one slab (done once, reused per call).
    slab, offs = pack_params(params, S_DIM, H_DIM)

    out = jax.block_until_ready(v_net_forward(state, slab, offs, S_DIM, H_DIM))
    ref = jax.block_until_ready(v_net_reference(state, params))
    assert out.shape == (B, 1), out.shape
    assert jnp.allclose(out, ref, atol=1e-5, rtol=1e-5), (out, ref)

    # Secondary check: batch not a multiple of the lane tile (exercises padding).
    B2 = 300
    state2 = jax.random.normal(jax.random.PRNGKey(1), (B2, S_DIM), dtype=jnp.float32)
    out2 = jax.block_until_ready(v_net_forward(state2, slab, offs, S_DIM, H_DIM))
    ref2 = v_net_reference(state2, params)
    assert out2.shape == (B2, 1), out2.shape
    assert jnp.allclose(out2, ref2, atol=1e-5, rtol=1e-5)

    print("KERNEL_OK")
</pallas_src>

<mosaic_0001>
module attributes {stable_mosaic.version = 11 : i64} {
  func.func @_vnet_kernel(%arg0: i32, %arg1: memref<8x128xf32, #tpu.memory_space<vmem>>, %arg2: memref<96x128xf32, #tpu.memory_space<vmem>>, %arg3: memref<1x128xf32, #tpu.memory_space<vmem>>) attributes {dimension_semantics = [#tpu.dimension_semantics<parallel>], iteration_bounds = array<i64: 1>, scalar_prefetch = 0 : i64, scratch_operands = 0 : i64, tpu.core_type = #tpu.core_type<tc>, window_params = [{transform_indices = @transform_0, window_bounds = array<i64: 8, 128>}, {pipeline_mode = #tpu.pipeline_mode<synchronous>, transform_indices = @transform_1, window_bounds = array<i64: 96, 128>}, {transform_indices = @transform_2, window_bounds = array<i64: 1, 128>}]} {
    %c0 = arith.constant 0 : index
    %c0_0 = arith.constant 0 : index
    %0 = vector.load %arg1[%c0, %c0_0] : memref<8x128xf32, #tpu.memory_space<vmem>>, vector<8x128xf32>
    %c0_1 = arith.constant 0 : index
    %c0_2 = arith.constant 0 : index
    %1 = vector.load %arg2[%c0_1, %c0_2] : memref<96x128xf32, #tpu.memory_space<vmem>>, vector<32x8xf32>
    %c64 = arith.constant 64 : index
    %c1 = arith.constant 1 : index
    %2 = vector.load %arg2[%c64, %c1] : memref<96x128xf32, #tpu.memory_space<vmem>>, vector<32x1xf32>
    %cst = arith.constant dense<0.000000e+00> : vector<32x128xf32>
    %3 = tpu.matmul %1, %0, %cst {dimension_numbers = #tpu.dot_dimension_numbers<[1], [0], [0], [1], [0, 0, 1, 1], [], []>} : vector<32x8xf32>, vector<8x128xf32>, vector<32x128xf32> -> vector<32x128xf32>
    %4 = vector.broadcast %2 : vector<32x1xf32> to vector<32x128xf32>
    %5 = arith.addf %3, %4 : vector<32x128xf32>
    %cst_3 = arith.constant 0.000000e+00 : f32
    %6 = vector.broadcast %cst_3 : f32 to vector<32x128xf32>
    %7 = arith.maximumf %5, %6 : vector<32x128xf32>
    %c32 = arith.constant 32 : index
    %c0_4 = arith.constant 0 : index
    %8 = vector.load %arg2[%c32, %c0_4] : memref<96x128xf32, #tpu.memory_space<vmem>>, vector<32x32xf32>
    %c64_5 = arith.constant 64 : index
    %c2 = arith.constant 2 : index
    %9 = vector.load %arg2[%c64_5, %c2] : memref<96x128xf32, #tpu.memory_space<vmem>>, vector<32x1xf32>
    %cst_6 = arith.constant dense<0.000000e+00> : vector<32x128xf32>
    %10 = tpu.matmul %8, %7, %cst_6 {dimension_numbers = #tpu.dot_dimension_numbers<[1], [0], [0], [1], [0, 0, 1, 1], [], []>} : vector<32x32xf32>, vector<32x128xf32>, vector<32x128xf32> -> vector<32x128xf32>
    %11 = vector.broadcast %9 : vector<32x1xf32> to vector<32x128xf32>
    %12 = arith.addf %10, %11 : vector<32x128xf32>
    %cst_7 = arith.constant 0.000000e+00 : f32
    %13 = vector.broadcast %cst_7 : f32 to vector<32x128xf32>
    %14 = arith.maximumf %12, %13 : vector<32x128xf32>
    %c64_8 = arith.constant 64 : index
    %c0_9 = arith.constant 0 : index
    %15 = vector.load %arg2[%c64_8, %c0_9] : memref<96x128xf32, #tpu.memory_space<vmem>>, vector<32x1xf32>
    %c64_10 = arith.constant 64 : index
    %c3 = arith.constant 3 : index
    %16 = vector.load %arg2[%c64_10, %c3] : memref<96x128xf32, #tpu.memory_space<vmem>>, vector<1x1xf32>
    %17 = vector.broadcast %15 : vector<32x1xf32> to vector<32x128xf32>
    %18 = arith.mulf %14, %17 : vector<32x128xf32>
    %cst_11 = arith.constant dense<0.000000e+00> : vector<128xf32>
    %19 = vector.multi_reduction <add>, %18, %cst_11 [0] : vector<32x128xf32> to vector<128xf32>
    %20 = vector.shape_cast %19 : vector<128xf32> to vector<1x128xf32>
    %21 = vector.broadcast %16 : vector<1x1xf32> to vector<1x128xf32>
    %22 = arith.addf %20, %21 : vector<1x128xf32>
    %c0_12 = arith.constant 0 : index
    %c0_13 = arith.constant 0 : index
    %23 = vector.load %arg3[%c0_12, %c0_13] : memref<1x128xf32, #tpu.memory_space<vmem>>, vector<1x128xf32>
    tpu.vector_store %arg3[%c0_12, %c0_13], %22 {strides = array<i32>} : memref<1x128xf32, #tpu.memory_space<vmem>>, vector<1x128xf32>,
    return
  }
  func.func @transform_0(%arg0: i32) -> (i32, i32) {
    %c0_i32 = arith.constant 0 : i32
    %c0_i32_0 = arith.constant 0 : i32
    return %c0_i32, %arg0 : i32, i32
  }
  func.func @transform_1(%arg0: i32) -> (i32, i32) {
    %c0_i32 = arith.constant 0 : i32
    %c0_i32_0 = arith.constant 0 : i32
    %c0_i32_1 = arith.constant 0 : i32
    return %c0_i32, %c0_i32_0 : i32, i32
  }
  func.func @transform_2(%arg0: i32) -> (i32, i32) {
    %c0_i32 = arith.constant 0 : i32
    %c0_i32_0 = arith.constant 0 : i32
    return %c0_i32, %arg0 : i32, i32
  }
}

</mosaic_0001>

<bundles_post_ra>
// kernel: tpu_custom_call.1
= control target key start
LH: loop header
LB: loop body
LE: loop exit
PB: predicated region body
PF: predicated region fallthrough
CT: control target
= control target key end

     0   :  { %7 = vsyncpa [#allocation3], 0  ;;  %s518_s0 = inlined_call_operand.hbm [shape: f32[8,128], index: 0, kind: input, shape index: {}]   ;;  %s519_s1 = inlined_call_operand.hbm [shape: f32[96,128], index: 1, kind: input, shape index: {}]   ;;  %s520_s2 = inlined_call_operand.hbm [shape: f32[1,128], index: 2, kind: output, shape index: {}]  }
   0x1   :  { %8 = vsyncpa [#allocation6], 0 }
   0x2   :  { %9 = vsyncpa [#allocation4], 0  ;;  %s477_s9 = smov [#allocation2]   ;;  %s478_s11 = smov [#allocation5]  }
   0x3   :  { %s16_s10 = sshll.u32 %s477_s9, 4  ;;  %s25_s12 = sshll.u32 %s478_s11, 4  ;;  %s17_s10 = int_to_ptr.vmem [resolvable:$true] %s16_s10  ;;  %s26_s12 = int_to_ptr.vmem [resolvable:$true] %s25_s12 }
   0x4   :  { %s419_s13 = scalar_lea.vmem %s17_s10, 128  ;;  %p424_p1 = scmp.lt.s32.totalorder %s17_s10, %s17_s10 }
   0x5   :  { %p420_p0 = scmp.ne.s32.totalorder %s17_s10, %s419_s13  ;;  %p425_p2 = scmp.lt.s32.totalorder %s419_s13, %s419_s13 }
   0x7   :  { %p426_p3 = por %p425_p2, %p424_p1 }
   0x9   :  { %p427_p4 = pnand %p426_p3, %p420_p0 }
   0xb   :  { %430 = shalt.err (!%p427_p4)
}
   0xc   :  { %19 = dma.hbm_to_vmem [thread:$0]  %s518_s0, 128, %s17_s10, [#allocation3]  }
   0xd   :  { %s439_s16 = scalar_lea.vmem %s26_s12, 1536  ;;  %p444_p6 = scmp.lt.s32.totalorder %s26_s12, %s26_s12 }
   0xe   :  { %p440_p5 = scmp.ne.s32.totalorder %s26_s12, %s439_s16  ;;  %p445_p7 = scmp.lt.s32.totalorder %s439_s16, %s439_s16 }
  0x10   :  { %p446_p8 = por %p445_p7, %p444_p6 }
  0x12   :  { %p447_p9 = pnand %p446_p8, %p440_p5 }
  0x14   :  { %450 = shalt.err (!%p447_p9)
}
  0x15   :  { %s479_s17 = smov 128   ;;  %s480_s18 = smov 8  }
  0x16   :  { %31 = dma.hbm_to_vmem [thread:$0]  %s519_s1, 1536, %s26_s12, [#allocation6], %s479_s17, %s479_s17, %s480_s18  }
  0x17   :  { %471 = dma.done.wait [#allocation3], 128  }
  0x18   :  { %472 = vsyncadd [#allocation3], 4294967168 }
  0x19   :  { %473 = dma.done.wait [#allocation6], 1536  }
  0x1a   :  { %474 = vsyncadd [#allocation6], 4294965760  ;;  %v481_v0 = vmov 1   ;;  %vm67_vm0 = vcmask 64512   ;;  %v38_v1 = vld [vmem:[#allocation2] sm:$0xff]  ;;  %v39_v2 = vld [vmem:[#allocation5] sm:$0xff] }
  0x1b   :  { %405 = vset.pattern.permute.xlu1 %v481_v0  ;;  %404 = vset.pattern.permute.xlu0 %v481_v0  ;;  %v40_v3 = vld [vmem:[#allocation5 + $0x8] sm:$0xff]  ;;  %v41_v4 = vld [vmem:[#allocation5 + $0x10] sm:$0xff]  ;;  %v46_v5 = vld [vmem:[#allocation5 + $0x58] sm:$0xff]  ;;  %vm189_vm1 = vcmask 261120   ;;  %v482_v12 = vmov 2   ;;  %v483_v13 = vmov 0  }
  0x1c   :  { %365 = vmatprep.subr.mxu0 %v38_v1  ;;  %367 = vmatprep.mubr.msk.f32.mxu0 %vm67_vm0, %v39_v2  ;;  %v44_v6 = vld [vmem:[#allocation5 + $0x48] sm:$0xff]  ;;  %v45_v7 = vld [vmem:[#allocation5 + $0x50] sm:$0xff]  ;;  %v42_v8 = vld [vmem:[#allocation5 + $0x18] sm:$0xff]  ;;  %v484_v15 = vmov 3   ;;  %s485_s0 = smov [#allocation7]  }
  0x1d   :  { %366 = vmatpush3.msra.mxu0 %v38_v1  ;;  %64 = vperm.xlu0 %404, %v46_v5   ;;  %v43_v9 = vld [vmem:[#allocation5 + $0x40] sm:$0xff]  ;;  %v171_v11 = vld [vmem:[#allocation5 + $0x30] sm:$0xff]  ;;  %v170_v32 = vld [vmem:[#allocation5 + $0x28] sm:$0xff]  ;;  %s334_s1 = sshll.u32 %s485_s0, 4  ;;  %s335_s1 = int_to_ptr.vmem [resolvable:$true] %s334_s1 }
  0x1e   :  { %368 = vmatmul.mubr.msk.f32.vlgmr.msra.gmra.mxu0 %vm67_vm0, %v40_v3  ;;  %54 = vperm.xlu1 %405, %v44_v6   ;;  %v169_v10 = vld [vmem:[#allocation5 + $0x20] sm:$0xff]  ;;  %v172_v33 = vld [vmem:[#allocation5 + $0x38] sm:$0xff]  ;;  %s451_s21 = scalar_lea.vmem %s335_s1, 16  ;;  %s455_s22 = scalar_lea.vmem %s335_s1, 32 }
  0x1f   :  { %370 = vmatprep.mubr.msk.f32.mxu0 %vm67_vm0, %v41_v4  ;;  %384 = vmatprep.mubr.msk.f32.mxu1 %vm189_vm1, %v171_v11  ;;  %v291_v14 = vld [vmem:[#allocation5 + $0x40] sm:$0x1]  ;;  %p452_p10 = scmp.ne.s32.totalorder %s335_s1, %s451_s21  ;;  %p456_p11 = scmp.lt.s32.totalorder %s335_s1, %s335_s1 }
  0x20   :  { %p457_p12 = scmp.lt.s32.totalorder %s455_s22, %s451_s21 }
  0x21   :  { %59 = vperm.xlu0 %404, %v45_v7  }
  0x22   :  { %371 = vmatmul.mubr.msk.f32.gmra.mxu0 %vm67_vm0, %v42_v8  ;;  %49 = vperm.xlu1 %405, %v43_v9   ;;  %p458_p13 = por %p457_p12, %p456_p11 }
  0x23   :  { %381 = vmatprep.mubr.msk.f32.mxu0 %vm189_vm1, %v169_v10 }
  0x24   :  { %p459_p0 = pnand %p458_p13, %p452_p10 }
  0x25   :  { %406 = vset.pattern.permute.xlu0 %v482_v12 }
  0x26   :  { %407 = vset.pattern.permute.xlu1 %v482_v12  ;;  %174 = vperm.xlu0 %406, %v43_v9  }
  0x27   :  { %178 = vperm.xlu1 %407, %v44_v6  }
  0x2a   :  { %186 = vperm.xlu0 %406, %v46_v5  }
  0x2b   :  { %182 = vperm.xlu1 %407, %v45_v7  }
  0x2e   :  { %409 = vset.pattern.permute.xlu0 %v483_v13 }
  0x2f   :  { %408 = vset.pattern.permute.xlu1 %v483_v13  ;;  %297 = vperm.xlu0 %409, %v44_v6  }
  0x30   :  { %293 = vperm.xlu1 %408, %v43_v9  }
  0x33   :  { %410 = vset.pattern.permute.xlu0 %v484_v15 }
  0x34   :  { %301 = vperm.xlu1 %408, %v45_v7   ;;  %323 = vperm.xlu0 %410, %v291_v14  }
  0x38   :  { %305 = vperm.xlu1 %408, %v46_v5  }
  0x98   :  { %v65_v16 = vpop.permute.xlu0 %64 }
  0x99   :  { %v55_v17 = vpop.permute.xlu1 %54 }
  0x9c   :  { %v60_v21 = vpop.permute.xlu0 %59 }
  0x9d   :  { %v50_v23 = vpop.permute.xlu1 %49 }
  0xa1   :  { %v175_v36 = vpop.permute.xlu0 %174 }
  0xa2   :  { %v179_v34 = vpop.permute.xlu1 %178 }
  0xa5   :  { %v187_v38 = vpop.permute.xlu0 %186 }
  0xa6   :  { %v183_v35 = vpop.permute.xlu1 %182 }
  0xaa   :  { %v298_v49 = vpop.permute.xlu0 %297 }
  0xab   :  { %v294_v37 = vpop.permute.xlu1 %293 }
  0xaf   :  { %v302_v48 = vpop.permute.xlu1 %301  ;;  %v324_v2 = vpop.permute.xlu0 %323 }
  0xb3   :  { %v306_v57 = vpop.permute.xlu1 %305 }
  0xde   :  { %v369_v18 = vpop.f32.mrf.mxu0 }
  0xdf   :  { %v152_v25 = vadd.f32 %v369_v18, %v55_v17 }
  0xe0   :  { %v146_v19 = vpop.f32.mrf.mxu0 }
  0xe1   :  { %v147_v28 = vadd.f32 %v146_v19, %v50_v23  ;;  %v166_v30 = vmax.f32 %v152_v25, 0.0 }
  0xe2   :  { %v372_v20 = vpop.f32.mrf.mxu0 }
  0xe3   :  { %v162_v22 = vadd.f32 %v372_v20, %v65_v16  ;;  %v165_v31 = vmax.f32 %v147_v28, 0.0 }
  0xe4   :  { %v156_v24 = vpop.f32.mrf.mxu0 }
  0xe5   :  { %v168_v26 = vmax.f32 %v162_v22, 0.0  ;;  %v157_v27 = vadd.f32 %v156_v24, %v60_v21 }
  0xe7   :  { %v167_v29 = vmax.f32 %v157_v27, 0.0  ;;  %373 = vmatprep.subr.mxu0 %v168_v26  ;;  %387 = vmatprep.subr.mxu1 %v168_v26 }
  0xe8   :  { %374 = vmatpush3.msra.mxu0 %v168_v26  ;;  %391 = vmatpush3.msra.mxu1 %v168_v26 }
  0xe9   :  { %375 = vmatprep.subr.mxu0 %v167_v29  ;;  %388 = vmatprep.subr.mxu1 %v167_v29 }
  0xea   :  { %376 = vmatpush3.msra.mxu0 %v167_v29  ;;  %392 = vmatpush3.msra.mxu1 %v167_v29 }
  0xeb   :  { %377 = vmatprep.subr.mxu0 %v166_v30  ;;  %389 = vmatprep.subr.mxu1 %v166_v30 }
  0xec   :  { %378 = vmatpush3.msra.mxu0 %v166_v30  ;;  %393 = vmatpush3.msra.mxu1 %v166_v30 }
  0xed   :  { %379 = vmatprep.subr.mxu0 %v165_v31  ;;  %390 = vmatprep.subr.mxu1 %v165_v31 }
  0xee   :  { %380 = vmatpush3.msra.mxu0 %v165_v31  ;;  %394 = vmatpush3.msra.mxu1 %v165_v31 }
  0xef   :  { %382 = vmatmul.mubr.msk.f32.vlgmr.msra.gmra.mxu0 %vm189_vm1, %v170_v32  ;;  %385 = vmatmul.mubr.msk.f32.vlgmr.msra.gmra.mxu1 %vm189_vm1, %v172_v33 }
 0x1af   :  { %v383_v39 = vpop.f32.mrf.mxu0  ;;  %v386_v40 = vpop.f32.mrf.mxu1 }
 0x1b0   :  { %v274_v41 = vadd.f32 %v383_v39, %v179_v34  ;;  %v284_v45 = vadd.f32 %v386_v40, %v187_v38 }
 0x1b1   :  { %v268_v42 = vpop.f32.mrf.mxu0  ;;  %v278_v43 = vpop.f32.mrf.mxu1 }
 0x1b2   :  { %v288_v44 = vmax.f32 %v274_v41, 0.0  ;;  %v269_v46 = vadd.f32 %v268_v42, %v175_v36  ;;  %v279_v47 = vadd.f32 %v278_v43, %v183_v35  ;;  %v290_v52 = vmax.f32 %v284_v45, 0.0 }
 0x1b4   :  { %v287_v50 = vmax.f32 %v269_v46, 0.0  ;;  %v289_v51 = vmax.f32 %v279_v47, 0.0  ;;  %v309_v54 = vmul.f32 %v298_v49, %v288_v44  ;;  %v311_v58 = vmul.f32 %v306_v57, %v290_v52 }
 0x1b6   :  { %v308_v53 = vmul.f32 %v294_v37, %v287_v50  ;;  %v310_v55 = vmul.f32 %v302_v48, %v289_v51 }
 0x1b8   :  { %v312_v56 = vadd.f32 %v309_v54, %v308_v53 }
 0x1ba   :  { %v313_v59 = vadd.f32 %v312_v56, %v310_v55 }
 0x1bc   :  { %v314_v60 = vadd.f32 %v313_v59, %v311_v58 }
 0x1be   :  { %v315_v61 = vrot.slane %v314_v60, 4 }
 0x1c0   :  { %v316_v62 = vadd.f32 %v315_v61, %v314_v60 }
 0x1c2   :  { %v317_v63 = vrot.slane %v316_v62, 2 }
 0x1c4   :  { %v318_v0 = vadd.f32 %v317_v63, %v316_v62 }
 0x1c6   :  { %v319_v1 = vrot.slane %v318_v0, 1 }
 0x1c8   :  { %v320_v3 = vadd.f32 %v319_v1, %v318_v0 }
 0x1ca   :  { %v326_v4 = vadd.f32 %v324_v2, %v320_v3 }
 0x1cc   :  { %327 = vst [vmem:[#allocation7] sm:$0x1] %v326_v4 }
 0x1cd   :  { %462 = shalt.err (!%p459_p0)
}
 0x1ce   :  { %337 = dma.vmem_to_hbm [thread:$0]  %s335_s1, 16, %s520_s2, [#allocation4]  }
 0x1cf   :  { %475 = dma.done.wait [#allocation4], 16  }
 0x1d0   :  { %476 = vsyncadd [#allocation4], 4294967280 }
 0x1d1   :  { %341 = vsyncpa [#allocation3], 1 }
 0x1d2   :  { %342 = vsyncpa [#allocation6], 1 }
 0x1d3   :  { %343 = vsyncpa [#allocation4], 1 }

</bundles_post_ra>
